<compile_context>
chip_gen: v6e
topology: v6e:2x2x1
jax: 0.10.0
libtpu: 0.0.40
codegen_flags: <defaults>
</compile_context>

<pallas_src>
import jax
import jax.numpy as jnp
from jax import lax
from jax.experimental import pallas as pl
from jax.experimental.pallas import tpu as pltpu


def _round_up(x, m):
    return ((x + m - 1) // m) * m


def _make_block_kernel(Q, Ws, Lout, eps, slope, inv_p):
    """Kernel for one (image, Cout-tile) grid step. Static geometry baked in."""

    def kernel(xs_ref, w_ref, mask_ref, o_ref):
        # xs_ref:   (1, Kc, Lp)    space-to-depth'd, spatially-flattened, lane-padded input
        # w_ref:    (Q, Q, tC, Kc) conv weights regrouped per (qh, qw) shift
        # mask_ref: (1, Lout)      1.0 on valid output lanes, 0.0 on halo lanes
        # o_ref:    (1, tC, Lout)  lane-dense NC(HW) output tile
        acc = None
        for qh in range(Q):
            for qw in range(Q):
                d = qh * Ws + qw
                xsl = xs_ref[0, :, d:d + Lout]          # (Kc, Lout) static VMEM slice
                w = w_ref[qh, qw]                       # (tC, Kc)
                t = jnp.dot(w, xsl, preferred_element_type=jnp.float32)
                acc = t if acc is None else acc + t     # f32 accumulation

        mask = mask_ref[...]                            # (1, Lout) f32
        ym = acc * mask
        ssum = jnp.sum(ym, axis=1, keepdims=True)       # (tC, 1)  sum of y over valid lanes
        ssq = jnp.sum(ym * acc, axis=1, keepdims=True)  # (tC, 1)  sum of y^2 over valid lanes
        mean = ssum * inv_p
        var = ssq * inv_p - mean * mean                 # biased variance (InstanceNorm default)
        yn = (acc - mean) * lax.rsqrt(var + eps)
        out = jnp.where(yn > 0, yn, slope * yn)         # LeakyReLU(0.2)
        o_ref[0] = out.astype(o_ref.dtype)

    return kernel


def block_forward(x, weight, bias=None, *, stride=2, eps=1e-5, negative_slope=0.2,
                  compute_dtype=jnp.float32, out_dtype=jnp.float32):
    """Forward of Block: Conv2d(4x4, stride, pad=1 reflect) -> InstanceNorm2d -> LeakyReLU(0.2).

    x: (N, Cin, H, W) NCHW; weight: (Cout, Cin, 4, 4); bias: (Cout,) accepted but unused —
    InstanceNorm2d(affine=False) exactly cancels a per-channel constant, so the conv bias
    has no effect on the output (exact, not an approximation).
    """
    del bias
    if stride not in (1, 2, 4):
        raise ValueError("stride must divide the 4x4 kernel (1, 2, or 4)")
    N, Cin, H, W = x.shape
    Cout = weight.shape[0]
    KH = 4
    s = stride
    Q = KH // s                              # shifts per axis within a parity class
    H_out = (H + 2 - KH) // s + 1
    W_out = (W + 2 - KH) // s + 1
    Hs = H_out + Q - 1                       # subsampled rows needed (incl. halo)
    Ws = W_out + Q - 1                       # subsampled cols needed (incl. halo)
    L = Hs * Ws
    Lout = H_out * Ws                        # lane-dense per-channel output length (with halo cols)
    Lp = _round_up(L + Q, 128)               # lane-aligned; covers max shift + Lout
    Kc = s * s * Cin                         # concatenated contraction dim (classes x Cin)
    P = H_out * W_out

    # ---- host-side prep (≈1x input bytes; no 16x im2col, no post-kernel transpose) ----
    xp = jnp.pad(x, ((0, 0), (0, 0), (1, 1), (1, 1)), mode="reflect")   # (N, Cin, H+2, W+2)
    subs = []
    for rh in range(s):
        for rw in range(s):
            subs.append(
                lax.slice(xp, (0, 0, rh, rw),
                          (N, Cin, rh + s * (Hs - 1) + 1, rw + s * (Ws - 1) + 1),
                          (1, 1, s, s)))                                 # (N, Cin, Hs, Ws)
    xs = jnp.stack(subs, axis=1).reshape(N, Kc, L)                       # classes folded into channels
    xs = jnp.pad(xs, ((0, 0), (0, 0), (0, Lp - L))).astype(compute_dtype)

    # weights: (Cout, Cin, 4, 4) -> (Q, Q, Cout, s*s*Cin), matching xs channel order
    wk = weight.reshape(Cout, Cin, Q, s, Q, s)
    wk = jnp.transpose(wk, (2, 4, 0, 3, 5, 1)).reshape(Q, Q, Cout, Kc).astype(compute_dtype)

    # valid-lane mask: lane m = i*Ws + j is real output iff j < W_out
    col = jnp.arange(Lout, dtype=jnp.int32)
    mask = ((col % Ws) < W_out).astype(jnp.float32).reshape(1, Lout)

    # ---- grid & tiling ----
    tC = Cout if (Cout <= 128 or Cout % 128 != 0) else 128
    n_co = Cout // tC

    kernel = _make_block_kernel(Q, Ws, Lout, eps, negative_slope, 1.0 / float(P))

    out_flat = pl.pallas_call(
        kernel,
        out_shape=jax.ShapeDtypeStruct((N, Cout, Lout), out_dtype),
        grid_spec=pltpu.PrefetchScalarGridSpec(
            num_scalar_prefetch=0,
            grid=(N, n_co),
            in_specs=[
                pl.BlockSpec((1, Kc, Lp), lambda n, co: (n, 0, 0)),
                pl.BlockSpec((Q, Q, tC, Kc), lambda n, co: (0, 0, co, 0)),
                pl.BlockSpec((1, Lout), lambda n, co: (0, 0)),
            ],
            out_specs=pl.BlockSpec((1, tC, Lout), lambda n, co: (n, co, 0)),
        ),
        compiler_params=pltpu.CompilerParams(
            dimension_semantics=("parallel", "parallel"),
            vmem_limit_bytes=48 * 1024 * 1024,   # headroom over 32 MiB default; < v7x 64 MiB physical
        ),
    )(xs, wk, mask)

    # lane-dense (N, Cout, H_out*Ws) -> NCHW: reshape is free, thin slice drops halo columns.
    return out_flat.reshape(N, Cout, H_out, Ws)[:, :, :, :W_out]


def _reference(x, weight, bias, stride, eps=1e-5, slope=0.2):
    xp = jnp.pad(x, ((0, 0), (0, 0), (1, 1), (1, 1)), mode="reflect")
    y = lax.conv_general_dilated(
        xp, weight, (stride, stride), "VALID",
        dimension_numbers=("NCHW", "OIHW", "NCHW"),
    ) + bias[None, :, None, None]
    mean = y.mean(axis=(2, 3), keepdims=True)
    var = ((y - mean) ** 2).mean(axis=(2, 3), keepdims=True)
    yn = (y - mean) * lax.rsqrt(var + eps)
    return jnp.where(yn > 0, yn, slope * yn)


if __name__ == "__main__":
    key = jax.random.PRNGKey(0)
    kx, kw, kb = jax.random.split(key, 3)

    N, Cin, Cout, H, W = 2, 4, 8, 16, 16
    x = jax.random.normal(kx, (N, Cin, H, W), dtype=jnp.float32)
    weight = 0.1 * jax.random.normal(kw, (Cout, Cin, 4, 4), dtype=jnp.float32)
    bias = 0.1 * jax.random.normal(kb, (Cout,), dtype=jnp.float32)

    # stride=2, f32 path — must match the PyTorch-equivalent reference tightly.
    out2 = jax.block_until_ready(block_forward(x, weight, bias, stride=2))
    ref2 = _reference(x, weight, bias, 2)
    assert out2.shape == ref2.shape, (out2.shape, ref2.shape)
    assert jnp.allclose(out2, ref2, rtol=1e-4, atol=1e-4), "stride-2 f32 mismatch"

    # stride=1, f32 path.
    out1 = jax.block_until_ready(block_forward(x, weight, bias, stride=1))
    ref1 = _reference(x, weight, bias, 1)
    assert out1.shape == ref1.shape, (out1.shape, ref1.shape)
    assert jnp.allclose(out1, ref1, rtol=1e-4, atol=1e-4), "stride-1 f32 mismatch"

    # stride=2, bf16 MXU-operand / bf16-output path (f32 accumulation & norm math inside).
    outb = jax.block_until_ready(
        block_forward(x, weight, bias, stride=2,
                      compute_dtype=jnp.bfloat16, out_dtype=jnp.bfloat16))
    assert outb.shape == ref2.shape, (outb.shape, ref2.shape)
    assert jnp.allclose(outb.astype(jnp.float32), ref2, rtol=5e-2, atol=5e-2), "bf16 mismatch"

    print("KERNEL_OK")
</pallas_src>

<mosaic_0001>
module attributes {stable_mosaic.version = 11 : i64} {
  func.func @kernel(%arg0: i32, %arg1: i32, %arg2: memref<1x16x128xf32, #tpu.memory_space<vmem>>, %arg3: memref<2x2x8x16xf32, #tpu.memory_space<vmem>>, %arg4: memref<1x72xf32, #tpu.memory_space<vmem>>, %arg5: memref<1x8x72xf32, #tpu.memory_space<vmem>>) attributes {dimension_semantics = [#tpu.dimension_semantics<parallel>, #tpu.dimension_semantics<parallel>], iteration_bounds = array<i64: 2, 1>, scalar_prefetch = 0 : i64, scratch_operands = 0 : i64, tpu.core_type = #tpu.core_type<tc>, window_params = [{transform_indices = @transform_0, window_bounds = array<i64: 1, 16, 128>}, {transform_indices = @transform_1, window_bounds = array<i64: 2, 2, 8, 16>}, {pipeline_mode = #tpu.pipeline_mode<synchronous>, transform_indices = @transform_2, window_bounds = array<i64: 1, 72>}, {transform_indices = @transform_3, window_bounds = array<i64: 1, 8, 72>}]} {
    %c0 = arith.constant 0 : index
    %c0_0 = arith.constant 0 : index
    %c0_1 = arith.constant 0 : index
    %0 = vector.load %arg2[%c0, %c0_0, %c0_1] : memref<1x16x128xf32, #tpu.memory_space<vmem>>, vector<1x16x72xf32>
    %1 = vector.shape_cast %0 : vector<1x16x72xf32> to vector<16x72xf32>
    %c0_2 = arith.constant 0 : index
    %c0_3 = arith.constant 0 : index
    %c0_4 = arith.constant 0 : index
    %c0_5 = arith.constant 0 : index
    %2 = vector.load %arg3[%c0_2, %c0_3, %c0_4, %c0_5] : memref<2x2x8x16xf32, #tpu.memory_space<vmem>>, vector<1x1x8x16xf32>
    %3 = vector.shape_cast %2 : vector<1x1x8x16xf32> to vector<8x16xf32>
    %cst = arith.constant dense<0.000000e+00> : vector<8x72xf32>
    %4 = tpu.matmul %3, %1, %cst {dimension_numbers = #tpu.dot_dimension_numbers<[1], [0], [0], [1], [0, 0, 1, 1], [], []>} : vector<8x16xf32>, vector<16x72xf32>, vector<8x72xf32> -> vector<8x72xf32>
    %c0_6 = arith.constant 0 : index
    %c0_7 = arith.constant 0 : index
    %c1 = arith.constant 1 : index
    %5 = vector.load %arg2[%c0_6, %c0_7, %c1] : memref<1x16x128xf32, #tpu.memory_space<vmem>>, vector<1x16x72xf32>
    %6 = vector.shape_cast %5 : vector<1x16x72xf32> to vector<16x72xf32>
    %c0_8 = arith.constant 0 : index
    %c1_9 = arith.constant 1 : index
    %c0_10 = arith.constant 0 : index
    %c0_11 = arith.constant 0 : index
    %7 = vector.load %arg3[%c0_8, %c1_9, %c0_10, %c0_11] : memref<2x2x8x16xf32, #tpu.memory_space<vmem>>, vector<1x1x8x16xf32>
    %8 = vector.shape_cast %7 : vector<1x1x8x16xf32> to vector<8x16xf32>
    %cst_12 = arith.constant dense<0.000000e+00> : vector<8x72xf32>
    %9 = tpu.matmul %8, %6, %cst_12 {dimension_numbers = #tpu.dot_dimension_numbers<[1], [0], [0], [1], [0, 0, 1, 1], [], []>} : vector<8x16xf32>, vector<16x72xf32>, vector<8x72xf32> -> vector<8x72xf32>
    %10 = arith.addf %4, %9 : vector<8x72xf32>
    %c0_13 = arith.constant 0 : index
    %c0_14 = arith.constant 0 : index
    %c9 = arith.constant 9 : index
    %11 = vector.load %arg2[%c0_13, %c0_14, %c9] : memref<1x16x128xf32, #tpu.memory_space<vmem>>, vector<1x16x72xf32>
    %12 = vector.shape_cast %11 : vector<1x16x72xf32> to vector<16x72xf32>
    %c1_15 = arith.constant 1 : index
    %c0_16 = arith.constant 0 : index
    %c0_17 = arith.constant 0 : index
    %c0_18 = arith.constant 0 : index
    %13 = vector.load %arg3[%c1_15, %c0_16, %c0_17, %c0_18] : memref<2x2x8x16xf32, #tpu.memory_space<vmem>>, vector<1x1x8x16xf32>
    %14 = vector.shape_cast %13 : vector<1x1x8x16xf32> to vector<8x16xf32>
    %cst_19 = arith.constant dense<0.000000e+00> : vector<8x72xf32>
    %15 = tpu.matmul %14, %12, %cst_19 {dimension_numbers = #tpu.dot_dimension_numbers<[1], [0], [0], [1], [0, 0, 1, 1], [], []>} : vector<8x16xf32>, vector<16x72xf32>, vector<8x72xf32> -> vector<8x72xf32>
    %16 = arith.addf %10, %15 : vector<8x72xf32>
    %c0_20 = arith.constant 0 : index
    %c0_21 = arith.constant 0 : index
    %c10 = arith.constant 10 : index
    %17 = vector.load %arg2[%c0_20, %c0_21, %c10] : memref<1x16x128xf32, #tpu.memory_space<vmem>>, vector<1x16x72xf32>
    %18 = vector.shape_cast %17 : vector<1x16x72xf32> to vector<16x72xf32>
    %c1_22 = arith.constant 1 : index
    %c1_23 = arith.constant 1 : index
    %c0_24 = arith.constant 0 : index
    %c0_25 = arith.constant 0 : index
    %19 = vector.load %arg3[%c1_22, %c1_23, %c0_24, %c0_25] : memref<2x2x8x16xf32, #tpu.memory_space<vmem>>, vector<1x1x8x16xf32>
    %20 = vector.shape_cast %19 : vector<1x1x8x16xf32> to vector<8x16xf32>
    %cst_26 = arith.constant dense<0.000000e+00> : vector<8x72xf32>
    %21 = tpu.matmul %20, %18, %cst_26 {dimension_numbers = #tpu.dot_dimension_numbers<[1], [0], [0], [1], [0, 0, 1, 1], [], []>} : vector<8x16xf32>, vector<16x72xf32>, vector<8x72xf32> -> vector<8x72xf32>
    %22 = arith.addf %16, %21 : vector<8x72xf32>
    %c0_27 = arith.constant 0 : index
    %c0_28 = arith.constant 0 : index
    %23 = vector.load %arg4[%c0_27, %c0_28] : memref<1x72xf32, #tpu.memory_space<vmem>>, vector<1x72xf32>
    %24 = vector.broadcast %23 : vector<1x72xf32> to vector<8x72xf32>
    %25 = arith.mulf %22, %24 : vector<8x72xf32>
    %cst_29 = arith.constant dense<0.000000e+00> : vector<8xf32>
    %26 = vector.multi_reduction <add>, %25, %cst_29 [1] : vector<8x72xf32> to vector<8xf32>
    %27 = vector.shape_cast %26 : vector<8xf32> to vector<8x1xf32>
    %28 = arith.mulf %25, %22 : vector<8x72xf32>
    %cst_30 = arith.constant dense<0.000000e+00> : vector<8xf32>
    %29 = vector.multi_reduction <add>, %28, %cst_30 [1] : vector<8x72xf32> to vector<8xf32>
    %30 = vector.shape_cast %29 : vector<8xf32> to vector<8x1xf32>
    %cst_31 = arith.constant 1.562500e-02 : f32
    %31 = vector.broadcast %cst_31 : f32 to vector<8x1xf32>
    %32 = arith.mulf %27, %31 : vector<8x1xf32>
    %cst_32 = arith.constant 1.562500e-02 : f32
    %33 = vector.broadcast %cst_32 : f32 to vector<8x1xf32>
    %34 = arith.mulf %30, %33 : vector<8x1xf32>
    %35 = arith.mulf %32, %32 : vector<8x1xf32>
    %36 = arith.subf %34, %35 : vector<8x1xf32>
    %37 = vector.broadcast %32 : vector<8x1xf32> to vector<8x72xf32>
    %38 = arith.subf %22, %37 : vector<8x72xf32>
    %cst_33 = arith.constant 9.99999974E-6 : f32
    %39 = vector.broadcast %cst_33 : f32 to vector<8x1xf32>
    %40 = arith.addf %36, %39 : vector<8x1xf32>
    %41 = math.rsqrt %40 : vector<8x1xf32>
    %42 = vector.broadcast %41 : vector<8x1xf32> to vector<8x72xf32>
    %43 = arith.mulf %38, %42 : vector<8x72xf32>
    %cst_34 = arith.constant 0.000000e+00 : f32
    %44 = vector.broadcast %cst_34 : f32 to vector<8x72xf32>
    %45 = arith.cmpf ogt, %43, %44 : vector<8x72xf32>
    %cst_35 = arith.constant 2.000000e-01 : f32
    %46 = vector.broadcast %cst_35 : f32 to vector<8x72xf32>
    %47 = arith.mulf %46, %43 : vector<8x72xf32>
    %48 = arith.select %45, %43, %47 : vector<8x72xi1>, vector<8x72xf32>
    %c0_36 = arith.constant 0 : index
    %c0_37 = arith.constant 0 : index
    %c0_38 = arith.constant 0 : index
    %49 = vector.load %arg5[%c0_36, %c0_37, %c0_38] : memref<1x8x72xf32, #tpu.memory_space<vmem>>, vector<1x8x72xf32>
    %50 = vector.shape_cast %49 : vector<1x8x72xf32> to vector<8x72xf32>
    %51 = vector.shape_cast %48 : vector<8x72xf32> to vector<1x8x72xf32>
    tpu.vector_store %arg5[%c0_36, %c0_37, %c0_38], %51 {strides = array<i32>} : memref<1x8x72xf32, #tpu.memory_space<vmem>>, vector<1x8x72xf32>,
    return
  }
  func.func @transform_0(%arg0: i32, %arg1: i32) -> (i32, i32, i32) {
    %c0_i32 = arith.constant 0 : i32
    %c0_i32_0 = arith.constant 0 : i32
    %c0_i32_1 = arith.constant 0 : i32
    return %arg0, %c0_i32, %c0_i32_0 : i32, i32, i32
  }
  func.func @transform_1(%arg0: i32, %arg1: i32) -> (i32, i32, i32, i32) {
    %c0_i32 = arith.constant 0 : i32
    %c0_i32_0 = arith.constant 0 : i32
    %c0_i32_1 = arith.constant 0 : i32
    %c0_i32_2 = arith.constant 0 : i32
    return %c0_i32, %c0_i32_0, %arg1, %c0_i32_1 : i32, i32, i32, i32
  }
  func.func @transform_2(%arg0: i32, %arg1: i32) -> (i32, i32) {
    %c0_i32 = arith.constant 0 : i32
    %c0_i32_0 = arith.constant 0 : i32
    %c0_i32_1 = arith.constant 0 : i32
    return %c0_i32, %c0_i32_0 : i32, i32
  }
  func.func @transform_3(%arg0: i32, %arg1: i32) -> (i32, i32, i32) {
    %c0_i32 = arith.constant 0 : i32
    %c0_i32_0 = arith.constant 0 : i32
    return %arg0, %arg1, %c0_i32 : i32, i32, i32
  }
}

</mosaic_0001>

<bundles_post_ra>
// kernel: tpu_custom_call.1
= control target key start
LH: loop header
LB: loop body
LE: loop exit
PB: predicated region body
PF: predicated region fallthrough
CT: control target
= control target key end

     0   :  { %8 = vsyncpa [#allocation3], 0  ;;  %s1191_s0 = inlined_call_operand.hbm [shape: f32[2,16,128], index: 0, kind: input, shape index: {}]   ;;  %s1192_s1 = inlined_call_operand.hbm [shape: f32[2,2,8,16], index: 1, kind: input, shape index: {}]   ;;  %s1193_s2 = inlined_call_operand.vmem [shape: f32[1,72], index: 2, kind: input, shape index: {}]   ;;  %s1194_s3 = inlined_call_operand.hbm [shape: f32[2,8,72], index: 3, kind: output, shape index: {}]  }
   0x1   :  { %10 = vsyncpa [#allocation3 + $0x1], 0 }
   0x2   :  { %11 = vsyncpa [#allocation6], 0 }
   0x3   :  { %12 = vsyncpa [#allocation4], 0 }
   0x4   :  { %14 = vsyncpa [#allocation4 + $0x1], 0  ;;  %s997_s12 = smov 0   ;;  %s999_s13 = smov 0  }
   0x5   :  { %s1001_s14 = smov 0   ;;  %s1003_s15 = smov 0  }
   0x6   :  { %s1005_s16 = smov 0   ;;  %s1007_s17 = smov 0  }
   0x7 LB: > { %s683_s18 = sadd.s32 4294967295, %s965_s17   ;;  %s684_s19 = sadd.s32 4294967294, %s965_s17   ;;  %s965_s17 = sphi %s1007_s17, %s20_s17   ;;  %s961_s16 = sphi %s1005_s16, %s1216_s16   ;;  %s957_s15 = sphi %s1003_s15, %s1215_s15   ;;  %s953_s14 = sphi %s1001_s14, %s1214_s14   ;;  %s949_s13 = sphi %s999_s13, %s1213_s13   ;;  %s945_s12 = sphi %s997_s12, %s1212_s12  }
   0x8   : > { %p52_p0 = scmp.ne.s32.totalorder %s949_s13, %s945_s12  ;;  %p1031_p1 = scmp.eq.s32.totalorder %s683_s18, 0 }
   0x9   : > { %p1035_p2 = scmp.eq.s32.totalorder %s683_s18, 1  ;;  %p131_p3 = scmp.eq.s32.totalorder %s684_s19, 1 }
   0xa   : > { %p1041_p4 = por %p1031_p1, %p52_p0  ;;  %p685_p5 = scmp.ge.s32.totalorder %s965_s17, 1 }
   0xb   : > { %p1046_p6 = por %p131_p3, %p52_p0  ;;  %p138_p7 = scmp.lt.s32.totalorder %s965_s17, 3 }
   0xc   : > { %s1200_s22 = scalar_select %p1041_p4, 1, 0 }
   0xd   : > { %s1201_s23 = scalar_select %p1046_p6, 1, 0 }
   0xe   : > { %p1051_p8 = pnand %p685_p5, %p138_p7  ;;  %s967_s25 = smov [#allocation5]  }
   0xf   : > { %s152_s26 = sshll.u32 %s967_s25, 4  ;;  %s32_s28 = sadd.s32 1, %s961_s16  ;;  %s153_s26 = int_to_ptr.vmem [resolvable:$true] %s152_s26 }
  0x10   : > { %p753_p9 = pneg %p1051_p8  ;;  %s838_s29 = scalar_lea.vmem %s153_s26, 512 }
  0x11   : > { %p839_p13 = scmp.ne.s32.totalorder %s153_s26, %s838_s29  ;;  %p846_p5 = scmp.lt.s32.totalorder %s153_s26, %s153_s26 }
  0x12   : > { %p1060_p11 = pnand %p753_p9, %p1031_p1  ;;  %p847_p7 = scmp.lt.s32.totalorder %s838_s29, %s838_s29 }
  0x14   : > { %p829_p12 = pneg %p1060_p11  ;;  %p848_p6 = por %p847_p7, %p846_p5 }
  0x16   : > { %p841_p0 = pnand %p839_p13, %p829_p12 }
  0x18   : > { %p842_p3 = pneg %p841_p0 }
  0x1a   : > { %p849_p4 = pnand %p848_p6, %p842_p3 }
  0x1c   : > { %852 = shalt.err (!%p849_p4)
}
  0x1d   : > { %s1196_s30 = smov 128   ;;  %s1197_s4 = smov 8  }
  0x1e   : > { %756 = dma.hbm_to_vmem [thread:$0]  (!%p1060_p11), %s1192_s1, 512, %s153_s26, [#allocation6], %s1196_s30, %s1196_s30, %s1197_s4  }
  0x1f   : > { %p34_p4 = scmp.ge.s32.totalorder %s32_s28, 2  ;;  %s39_s7 = sadd.s32 1, %s953_s14 }
  0x20   : > { %p46_p6 = scmp.ne.s32.totalorder %s953_s14, %s949_s13  ;;  %p47_p9 = scmp.eq.s32.totalorder %s965_s17, 0 }
  0x21   : > { %s1218_s28 = smov (%p34_p4, %s32_s28), 0  ;;  %p766_p0 = scmp.lt.s32.totalorder %s965_s17, 2 }
  0x22   : > { %p1081_p12 = por %p47_p9, %p46_p6  ;;  %p1087_p13 = por %p1035_p2, %p46_p6 }
  0x23   : > { %s36_s10 = ssub.s32 %s961_s16, %s1218_s28  ;;  %s169_s11 = sand.u32 1, %s953_s14  }
  0x24   : > { %p37_p11 = scmp.eq.s32.totalorder %s36_s10, 0  ;;  %s688_s18 = sshll.u32 %s169_s11, 4 }
  0x25   : > { %s704_s25 = sshll.u32 %s961_s16, 8  ;;  %s173_s5 = scalar_lea.vmem [#allocation2], %s688_s18 }
  0x26   : > { %s1096_s19 = scalar_select %p37_p11, %s953_s14, %s39_s7  }
  0x27   : > { %s179_s29 = scalar_lea.hbm %s1191_s0, %s704_s25  ;;  %s180_s6 = sshll.u32 %s173_s5, 4  ;;  %s181_s6 = int_to_ptr.vmem [resolvable:$true] %s180_s6 }
  0x28   : > { %p1104_p2 = pnand %p766_p0, %p1081_p12  ;;  %s170_s30 = scalar_lea.sflag [#allocation3], %s169_s11 }
  0x29   : > { %s866_s10 = scalar_lea.vmem %s181_s6, 256  ;;  %s970_s7 = smov [#allocation2]  }
  0x2a   : > { %p855_p3 = pneg %p1104_p2  ;;  %p867_p5 = scmp.ne.s32.totalorder %s181_s6, %s866_s10 }
  0x2b   : > { %s871_s4 = sshll.u32 %s970_s7, 4  ;;  %s872_s4 = int_to_ptr.vmem [resolvable:$false] %s871_s4 }
  0x2c   : > { %p869_p7 = pnand %p867_p5, %p855_p3  ;;  %s873_s25 = scalar_lea.vmem %s872_s4, 512 }
  0x2d   : > { %p874_p6 = scmp.lt.s32.totalorder %s181_s6, %s872_s4  ;;  %p875_p9 = scmp.lt.s32.totalorder %s873_s25, %s866_s10 }
  0x2e   : > { %p870_p4 = pneg %p869_p7 }
  0x2f   : > { %p876_p11 = por %p875_p9, %p874_p6 }
  0x31   : > { %p877_p10 = pnand %p876_p11, %p870_p4 }
  0x33   : > { %880 = shalt.err (!%p877_p10)
}
  0x34   : > { %s1207_s8 = smov 8   ;;  %s1208_s18 = smov 128  }
  0x35   : > { %760 = dma.hbm_to_vmem [thread:$0]  (!%p1104_p2), %s179_s29, 256, %s181_s6, %s170_s30, %s1208_s18, %s1208_s18, %s1207_s8  }
  0x36   : > { %192 = sbr.rel (%p1051_p8) target bundleno = 567 (0x237), region = 32  ;;  %s1118_s11 = sand.u32 (!%p1051_p8), 1, %s949_s13  }
  0x37   : > { %s692_s4 = sshll.u32 (!%p1051_p8), %s1118_s11, 4  ;;  %s195_s26 = scalar_lea.sflag (!%p1051_p8), [#allocation3], %s1118_s11 }
  0x38   : > { %s198_s27 = scalar_lea.vmem (!%p1051_p8), [#allocation2], %s692_s4  ;;  %p1209_p12 = scmp.ne.s32.totalorder (!%p1051_p8), %s1200_s22, 0 }
  0x3b   : > { %932 = dma.done.wait (%p1209_p12), %s195_s26, 256  }
  0x3c   : > { %934 = vsyncadd (%p1209_p12), %s195_s26, 4294967040 }
  0x3d   : > { %936 = dma.done.wait (%p1031_p1), [#allocation6], 512  }
  0x3e   : > { %938 = vsyncadd (%p1031_p1), [#allocation6], 4294966784  ;;  %v971_v0 = vmov 0.0   ;;  %vm972_vm0 = vmmov 0   ;;  %v226_v1 = vld [vmem:[%s198_s27 + $0x8] sm:$0xff]  ;;  %s973_s24 = smov 127  }
  0x3f   : > { %717 = vmatprep.subr.mxu0 %v971_v0  ;;  %724 = vmatprep.subr.mxu1 %v971_v0  ;;  %s974_s30 = smov 119   ;;  %v225_v2 = vld [vmem:[%s198_s27] sm:$0xff]  ;;  %vm238_vm1 = vcmask 130048   ;;  %s975_s20 = smov 118   ;;  %v229_v6 = vld [vmem:[#allocation5 + $0x8] sm:$0xff]  ;;  %v468_v12 = vld [vmem:[#allocation5 + $0x18] sm:$0xff] }
  0x40   : > { %721 = vmatprep.mubr.msk.f32.mxu0 %vm972_vm0, %v971_v0  ;;  %728 = vmatprep.mubr.msk.f32.mxu1 %vm972_vm0, %v971_v0  ;;  %v227_v3 = vld [vmem:[#allocation5] sm:$0xff]  ;;  %v386_v9 = vld [vmem:[#allocation5 + $0x10] sm:$0xff]  ;;  %vm557_vm2 = vcmask 588800   ;;  %s694_s5 = sshll.u32 %s1118_s11, 3  ;;  %s701_s6 = sshll.u32 %s957_s15, 7 }
  0x41   : > { %234 = vrot.lane.b32.xlu0 %v226_v1, %s973_s24  ;;  %389 = vrot.lane.b32.xlu1 %v226_v1, %s974_s30  ;;  %v699_v22 = vld [vmem:[%s1193_s2] ss:$0 sm:$0xff]  ;;  %s224_s21 = scalar_lea.vmem [#allocation7], %s694_s5  ;;  %s1148_s8 = scalar_lea.hbm %s1194_s3, %s701_s6 }
  0x42   : > { %725 = vmatpush3.msra.mxu1 %v226_v1  ;;  %s592_s10 = sshll.u32 %s224_s21, 4  ;;  %s578_s18 = scalar_lea.sflag [#allocation4], %s1118_s11  ;;  %s593_s10 = int_to_ptr.vmem [resolvable:$true] %s592_s10 }
  0x43   : > { %726 = vmatprep.subr.mxu1 %v971_v0  ;;  %s881_s4 = scalar_lea.vmem %s593_s10, 128  ;;  %s976_s15 = smov [#allocation7]  }
  0x44   : > { %727 = vmatpush3.msra.mxu1 %v225_v2  ;;  %p882_p1 = scmp.ne.s32.totalorder %s593_s10, %s881_s4  ;;  %s885_s26 = sshll.u32 %s976_s15, 4  ;;  %s886_s26 = int_to_ptr.vmem [resolvable:$false] %s885_s26 }
  0x45   : > { %232 = vrot.lane.b32.xlu0 %v225_v2, %s973_s24  ;;  %387 = vrot.lane.b32.xlu1 %v225_v2, %s974_s30  ;;  %s887_s27 = scalar_lea.vmem %s886_s26, 256  ;;  %p888_p0 = scmp.lt.s32.totalorder %s593_s10, %s886_s26 }
  0x46   : > { %729 = vmatmul.mubr.msk.f32.vlgmr.msra.gmra.mxu1 %vm238_vm1, %v227_v3  ;;  %738 = vmatprep.subr.mxu1 %v971_v0  ;;  %p883_p8 = pnand %p882_p1, %p1087_p13  ;;  %p889_p2 = scmp.lt.s32.totalorder %s887_s27, %s881_s4 }
  0x47   : > { %742 = vmatprep.mubr.msk.f32.mxu1 %vm972_vm0, %v971_v0 }
  0x48   : > { %p884_p10 = pneg %p883_p8  ;;  %p890_p3 = por %p889_p2, %p888_p0 }
  0x49   : > { %471 = vrot.lane.b32.xlu0 %v226_v1, %s975_s20  ;;  %469 = vrot.lane.b32.xlu1 %v225_v2, %s975_s20 }
  0x4a   : > { %p891_p5 = pnand %p890_p3, %p884_p10 }
  0xb3   : > { %v235_v4 = vpop.permute.xlu0 %234  ;;  %v390_v5 = vpop.permute.xlu1 %389 }
  0xb4   : > { %718 = vmatpush3.msra.mxu0 %v235_v4 }
  0xb5   : > { %719 = vmatprep.subr.mxu0 %v971_v0 }
  0xb7   : > { %v233_v7 = vpop.permute.xlu0 %232  ;;  %v388_v8 = vpop.permute.xlu1 %387 }
  0xb8   : > { %720 = vmatpush3.msra.mxu0 %v233_v7 }
  0xb9   : > { %722 = vmatmul.mubr.msk.f32.vlgmr.msra.gmra.mxu0 %vm238_vm1, %v229_v6  ;;  %731 = vmatprep.subr.mxu0 %v971_v0 }
  0xba   : > { %732 = vmatpush3.msra.mxu0 %v390_v5  ;;  %735 = vmatprep.mubr.msk.f32.mxu0 %vm972_vm0, %v971_v0 }
  0xbb   : > { %733 = vmatprep.subr.mxu0 %v971_v0  ;;  %v472_v10 = vpop.permute.xlu0 %471  ;;  %v470_v11 = vpop.permute.xlu1 %469 }
  0xbc   : > { %734 = vmatpush3.msra.mxu0 %v388_v8  ;;  %739 = vmatpush3.msra.mxu1 %v472_v10 }
  0xbd   : > { %736 = vmatmul.mubr.msk.f32.vlgmr.msra.gmra.mxu0 %vm238_vm1, %v386_v9  ;;  %740 = vmatprep.subr.mxu1 %v971_v0 }
  0xbe   : > { %741 = vmatpush3.msra.mxu1 %v470_v11 }
  0xbf   : > { %743 = vmatmul.mubr.msk.f32.vlgmr.msra.gmra.mxu1 %vm238_vm1, %v468_v12 }
 0x106   : > { %v381_v13 = vpop.f32.mrf.mxu1 }
 0x108   : > { %v730_v14 = vpop.f32.mrf.mxu1 }
 0x179   : > { %v308_v15 = vpop.f32.mrf.mxu0 }
 0x17a   : > { %v382_v17 = vadd.f32 %v381_v13, %v308_v15 }
 0x17b   : > { %v723_v16 = vpop.f32.mrf.mxu0 }
 0x17d   : > { %v462_v18 = vpop.f32.mrf.mxu0 }
 0x17e   : > { %v466_v19 = vadd.f32 %v462_v18, %v382_v17 }
 0x17f   : > { %v737_v20 = vpop.f32.mrf.mxu0  ;;  %v544_v21 = vpop.f32.mrf.mxu1 }
 0x180   : > { %v548_v23 = vadd.f32 %v544_v21, %v466_v19 }
 0x181   : > { %v744_v24 = vpop.f32.mrf.mxu1 }
 0x182   : > { %v556_v25 = vmul.f32 %v699_v22, %v548_v23 }
 0x184   : > { %v558_v26 = vsel %vm557_vm2, %v556_v25, 0.0  ;;  %v561_v27 = vmul.f32 %v556_v25, %v548_v23 }
 0x185   : > { %559 = vadd.xlane.f32.xlu0 %v558_v26 }
 0x186   : > { %v562_v28 = vsel %vm557_vm2, %v561_v27, 0.0 }
 0x187   : > { %563 = vadd.xlane.f32.xlu1 %v562_v28 }
 0x20e   : > { %v560_v29 = vpop.xlane.xlu0 %559 }
 0x20f   : > { %v565_v30 = vmul.f32 0.015625, %v560_v29 }
 0x210   : > { %v564_v31 = vpop.xlane.xlu1 %563 }
 0x211   : > { %v567_v32 = vmul.f32 %v565_v30, %v565_v30  ;;  %v566_v33 = vmul.f32 0.015625, %v564_v31  ;;  %v569_v36 = vsub.f32 %v548_v23, %v565_v30 }
 0x213   : > { %v568_v34 = vsub.f32 %v566_v33, %v567_v32 }
 0x215   : > { %v570_v35 = vadd.f32 1e-05, %v568_v34 }
 0x217   : > { %825 = vrsqrt.f32 %v570_v35 }
 0x224   : > { %v826_v37 = vpop.eup %825 }
 0x225   : > { %v572_v38 = vmul.f32 %v826_v37, %v569_v36 }
 0x227   : > { %vm573_vm3 = vcmp.gt.f32.partialorder %v572_v38, 0.0  ;;  %v574_v39 = vmul.f32 0.2, %v572_v38 }
 0x229   : > { %v575_v40 = vsel %vm573_vm3, %v572_v38, %v574_v39 }
 0x22a   : > { %576 = vst.msk [vmem:[%s224_s21] sm:$0xff] %vm557_vm2, %v575_v40 }
 0x22b   : > { %894 = shalt.err (!%p891_p5)
}
 0x22c   : > { %s895_s24 = scalar_lea.hbm %s1148_s8, 128  ;;  %s899_s20 = scalar_lea.hbm %s1194_s3, 256 }
 0x22d   : > { %p896_p7 = scmp.ne.s32.totalorder %s1148_s8, %s895_s24  ;;  %p900_p9 = scmp.lt.s32.totalorder %s1148_s8, %s1194_s3 }
 0x22e   : > { %p901_p11 = scmp.lt.s32.totalorder %s899_s20, %s895_s24 }
 0x22f   : > { %p897_p4 = pnand %p896_p7, %p1087_p13 }
 0x230   : > { %p902_p12 = por %p901_p11, %p900_p9 }
 0x231   : > { %p898_p6 = pneg %p897_p4 }
 0x233   : > { %p903_p1 = pnand %p902_p12, %p898_p6 }
 0x235   : > { %906 = shalt.err (!%p903_p1)
}
 0x236   : > { %751 = dma.vmem_to_hbm [thread:$0]  (%p1087_p13), %s593_s10, 128, %s1148_s8, %s578_s18  }
 0x237 PF: > { %s604_s5 = sand.u32 1, %s945_s12   ;;  %p1210_p8 = scmp.ne.s32.totalorder %s1201_s23, 0 }
 0x238   : > { %p1211_p10 = scmp.ge.s32.totalorder %s965_s17, 2  ;;  %s605_s6 = scalar_lea.sflag [#allocation4], %s604_s5 }
 0x23a   : > { %p762_p0 = pnand %p1211_p10, %p1210_p8 }
 0x23c   : > { %p763_p2 = pneg %p762_p0 }
 0x23e   : > { %940 = dma.done.wait (%p763_p2), %s605_s6, 128  }
 0x23f   : > { %942 = vsyncadd (%p763_p2), %s605_s6, 4294967168  ;;  %s20_s17 = sadd.s32 1, %s965_s17   ;;  %s1212_s12 = smov %s949_s13 }
 0x240   : > { %p17_p3 = scmp.ge.s32.totalorder %s20_s17, 4   ;;  %s1213_s13 = smov %s953_s14 }
 0x241   : > { %s1214_s14 = smov %s1096_s19  ;;  %s1215_s15 = smov %s961_s16 }
 0x242   : > { %s1216_s16 = smov %s1218_s28  ;;  %19 = sbr.rel (!%p17_p3) target bundleno = 7 (0x7), region = 85 }
 0x247   :  { %610 = vsyncpa [#allocation3], 1 }
 0x248   :  { %612 = vsyncpa [#allocation3 + $0x1], 1 }
 0x249   :  { %613 = vsyncpa [#allocation6], 1 }
 0x24a   :  { %614 = vsyncpa [#allocation4], 1 }
 0x24b   :  { %616 = vsyncpa [#allocation4 + $0x1], 1 }

</bundles_post_ra>
